<compile_context>
chip_gen: v6e
topology: v6e:2x2x1
jax: 0.10.0
libtpu: 0.0.40
codegen_flags: <defaults>
</compile_context>

<pallas_src>
import jax
import jax.numpy as jnp
import numpy as np
from jax.experimental import pallas as pl
from jax.experimental.pallas import tpu as pltpu

# --- module constants (from gpt.py) ---
N_EMBD = 192
N_HEAD = 4
HEAD_SIZE = N_EMBD // N_HEAD          # 48
BLOCK_SIZE = 256                      # max context; we require T <= BLOCK_SIZE


def mha_kernel(x_ref, wqkv_ref, bqkv_ref, wp_ref, bp_ref, o_ref):
    Bb, T, C = x_ref.shape
    M = Bb * T
    hs = HEAD_SIZE

    # fused row block (bf16 already, pre-cast in the wrapper)
    x = x_ref[...].reshape(M, C)

    # one lane-dense fused QKV projection: (M,192) @ (192,576), f32 accumulate.
    # Q-scale (1/sqrt(hs)) is already folded into wqkv / bqkv.
    qkv = jnp.dot(x, wqkv_ref[...],
                  preferred_element_type=jnp.float32) + bqkv_ref[...]

    # additive causal-mask bias; keep f32 (bf16 would turn -1e30 into -inf)
    row = jax.lax.broadcasted_iota(jnp.int32, (T, T), 0)
    col = jax.lax.broadcasted_iota(jnp.int32, (T, T), 1)
    mask_bias = jnp.where(row >= col, 0.0, -1e30).astype(jnp.float32)

    # TODO(synk): attention-dropout / proj-dropout omitted (eval mode).
    ctx_heads = []
    for h in range(N_HEAD):           # static 4-iter loop: only per-head math
        off = h * hs
        q = qkv[:, off:off + hs].astype(jnp.bfloat16).reshape(Bb, T, hs)
        k = qkv[:, C + off:C + off + hs].astype(jnp.bfloat16).reshape(Bb, T, hs)
        v = qkv[:, 2 * C + off:2 * C + off + hs].astype(jnp.bfloat16).reshape(Bb, T, hs)

        # attention scores per sample (batched over the fused batch dim)
        wei = jnp.einsum('btd,bsd->bts', q, k,
                         preferred_element_type=jnp.float32)
        wei = wei + mask_bias
        # f32 exp (bf16 exp is a v6e/v7x-only EUP option; keep f32 for v5e/accuracy)
        p = jnp.exp(wei - jnp.max(wei, axis=-1, keepdims=True))

        # unnormalized context, then normalize on the small (T, hs) tensor
        ctx = jnp.einsum('bts,bsd->btd', p.astype(jnp.bfloat16), v,
                         preferred_element_type=jnp.float32)
        inv = pl.reciprocal(jnp.sum(p, axis=-1, keepdims=True), approx=True)
        ctx_heads.append((ctx * inv).astype(jnp.bfloat16).reshape(M, hs))

    # assemble heads into one (M, 192) slab -> single lane-dense projection
    ctx_all = jnp.concatenate(ctx_heads, axis=-1)

    out = jnp.dot(ctx_all, wp_ref[...],
                  preferred_element_type=jnp.float32) + bp_ref[...]
    o_ref[...] = out.reshape(Bb, T, C).astype(o_ref.dtype)


def _choose_block_batch(B, T, target_rows=512, max_rows=2048, min_grid=2):
    """Largest useful divisor of B: aim for >= target_rows fused rows per grid
    step (MXU fill), cap rows at max_rows (VMEM budget, incl. v7x 64 MiB), and
    keep >= min_grid grid steps so v7x's two TensorCores both get work."""
    best = 1
    for d in range(1, B + 1):
        if B % d:
            continue
        if d * T > max_rows:
            break
        if B // d >= min_grid or d == 1:
            best = d
        if d * T >= target_rows:
            break
    return best


def prepare_params(p):
    """One-time weight fusion + bf16 cast (do NOT redo this every forward).

    Layout: w_qkv columns = [Q_h0..Q_h3 | K_h0..K_h3 | V_h0..V_h3], each head
    occupying 48 columns. The 1/sqrt(head_size) scale is folded into Q."""
    C, H, hs = N_EMBD, N_HEAD, HEAD_SIZE
    scale = hs ** -0.5

    wq = (p["wq"] * scale).transpose(1, 0, 2).reshape(C, H * hs)   # (C, 192)
    wk = p["wk"].transpose(1, 0, 2).reshape(C, H * hs)
    wv = p["wv"].transpose(1, 0, 2).reshape(C, H * hs)
    w_qkv = jnp.concatenate([wq, wk, wv], axis=1).astype(jnp.bfloat16)  # (C, 576)

    bq = (p["bq"] * scale).reshape(1, H * hs)
    bk = p["bk"].reshape(1, H * hs)
    bv = p["bv"].reshape(1, H * hs)
    b_qkv = jnp.concatenate([bq, bk, bv], axis=1).astype(jnp.float32)   # (1, 576)

    w_p = p["wp"].reshape(H * hs, C).astype(jnp.bfloat16)               # (192, 192)
    b_p = p["bp"].reshape(1, C).astype(jnp.float32)                     # (1, 192)
    return {"w_qkv": w_qkv, "b_qkv": b_qkv, "w_p": w_p, "b_p": b_p}


def _full_spec(a):
    nd = a.ndim
    return pl.BlockSpec(a.shape, lambda b, _nd=nd: (0,) * _nd)


def mha_forward(x, fused_params, block_batch=None):
    B, T, C = x.shape
    assert C == N_EMBD and T <= BLOCK_SIZE
    Bb = _choose_block_batch(B, T) if block_batch is None else block_batch
    assert B % Bb == 0

    # pre-cast activations to bf16: halves input DMA bytes per grid step
    x_bf = x.astype(jnp.bfloat16)

    args = [fused_params["w_qkv"], fused_params["b_qkv"],
            fused_params["w_p"], fused_params["b_p"]]

    in_specs = [pl.BlockSpec((Bb, T, C), lambda b: (b, 0, 0))] + \
               [_full_spec(a) for a in args]

    return pl.pallas_call(
        mha_kernel,
        out_shape=jax.ShapeDtypeStruct((B, T, C), x.dtype),
        grid=(B // Bb,),
        in_specs=in_specs,
        out_specs=pl.BlockSpec((Bb, T, C), lambda b: (b, 0, 0)),
        compiler_params=pltpu.CompilerParams(
            dimension_semantics=("parallel",),
            vmem_limit_bytes=48 * 1024 * 1024),
    )(x_bf, *args)


def mha_ref(x, p):
    """Pure-JAX (f32) reference matching PyTorch MultiHeadAttention.forward
    in eval mode (dropout = identity)."""
    B, T, C = x.shape
    causal = jnp.tril(jnp.ones((T, T), dtype=bool))
    scale = HEAD_SIZE ** -0.5
    outs = []
    for hd in range(N_HEAD):
        q = x @ p["wq"][hd] + p["bq"][hd]
        k = x @ p["wk"][hd] + p["bk"][hd]
        v = x @ p["wv"][hd] + p["bv"][hd]
        wei = jnp.einsum("btd,bsd->bts", q, k) * scale
        wei = jnp.where(causal, wei, -jnp.inf)
        wei = jax.nn.softmax(wei, axis=-1)
        outs.append(jnp.einsum("bts,bsd->btd", wei, v))
    cat = jnp.concatenate(outs, axis=-1)                      # (B, T, C)
    wp_full = p["wp"].reshape(N_HEAD * HEAD_SIZE, C)
    return cat @ wp_full + p["bp"]


def make_params(key):
    """Per-head weight layout: x @ W + b (equivalent to nn.Linear)."""
    ks = jax.random.split(key, 8)
    C, H, hs = N_EMBD, N_HEAD, HEAD_SIZE

    def w(k, shape, scale=0.02):
        return (scale * jax.random.normal(k, shape)).astype(jnp.float32)

    return {
        "wq": w(ks[0], (H, C, hs)), "bq": w(ks[1], (H, 1, hs), 0.01),
        "wk": w(ks[2], (H, C, hs)), "bk": w(ks[3], (H, 1, hs), 0.01),
        "wv": w(ks[4], (H, C, hs)), "bv": w(ks[5], (H, 1, hs), 0.01),
        "wp": w(ks[6], (H, hs, C)), "bp": w(ks[7], (1, C), 0.01),
    }


if __name__ == "__main__":
    key = jax.random.PRNGKey(0)
    kx, kp = jax.random.split(key)

    B, T = 2, 16
    x = jax.random.normal(kx, (B, T, N_EMBD), dtype=jnp.float32)
    params = make_params(kp)

    # one-time fused / bf16 weight preparation (cached across forward calls)
    fused = prepare_params(params)

    out = jax.block_until_ready(mha_forward(x, fused))
    ref = jax.block_until_ready(mha_ref(x, params))

    # bf16 MXU operands + approx reciprocal -> loosened tolerance vs f32 ref
    np.testing.assert_allclose(np.asarray(out), np.asarray(ref),
                               rtol=5e-2, atol=1e-2)
    print("KERNEL_OK")
</pallas_src>

<mosaic_0001>
module attributes {stable_mosaic.version = 11 : i64} {
  func.func @mha_kernel(%arg0: i32, %arg1: memref<1x16x192xbf16, #tpu.memory_space<vmem>>, %arg2: memref<192x576xbf16, #tpu.memory_space<vmem>>, %arg3: memref<1x576xf32, #tpu.memory_space<vmem>>, %arg4: memref<192x192xbf16, #tpu.memory_space<vmem>>, %arg5: memref<1x192xf32, #tpu.memory_space<vmem>>, %arg6: memref<1x16x192xf32, #tpu.memory_space<vmem>>) attributes {dimension_semantics = [#tpu.dimension_semantics<parallel>], iteration_bounds = array<i64: 2>, scalar_prefetch = 0 : i64, scratch_operands = 0 : i64, tpu.core_type = #tpu.core_type<tc>, window_params = [{transform_indices = @transform_0, window_bounds = array<i64: 1, 16, 192>}, {pipeline_mode = #tpu.pipeline_mode<synchronous>, transform_indices = @transform_1, window_bounds = array<i64: 192, 576>}, {pipeline_mode = #tpu.pipeline_mode<synchronous>, transform_indices = @transform_2, window_bounds = array<i64: 1, 576>}, {pipeline_mode = #tpu.pipeline_mode<synchronous>, transform_indices = @transform_3, window_bounds = array<i64: 192, 192>}, {pipeline_mode = #tpu.pipeline_mode<synchronous>, transform_indices = @transform_4, window_bounds = array<i64: 1, 192>}, {transform_indices = @transform_5, window_bounds = array<i64: 1, 16, 192>}]} {
    %c0 = arith.constant 0 : index
    %c0_0 = arith.constant 0 : index
    %c0_1 = arith.constant 0 : index
    %0 = vector.load %arg1[%c0, %c0_0, %c0_1] : memref<1x16x192xbf16, #tpu.memory_space<vmem>>, vector<1x16x192xbf16>
    %1 = vector.shape_cast %0 : vector<1x16x192xbf16> to vector<16x192xbf16>
    %c0_2 = arith.constant 0 : index
    %c0_3 = arith.constant 0 : index
    %2 = vector.load %arg2[%c0_2, %c0_3] : memref<192x576xbf16, #tpu.memory_space<vmem>>, vector<192x576xbf16>
    %cst = arith.constant dense<0.000000e+00> : vector<16x576xf32>
    %3 = tpu.matmul %1, %2, %cst {dimension_numbers = #tpu.dot_dimension_numbers<[1], [0], [0], [1], [0, 0, 1, 1], [], []>} : vector<16x192xbf16>, vector<192x576xbf16>, vector<16x576xf32> -> vector<16x576xf32>
    %c0_4 = arith.constant 0 : index
    %c0_5 = arith.constant 0 : index
    %4 = vector.load %arg3[%c0_4, %c0_5] : memref<1x576xf32, #tpu.memory_space<vmem>>, vector<1x576xf32>
    %5 = vector.broadcast %4 : vector<1x576xf32> to vector<16x576xf32>
    %6 = arith.addf %3, %5 : vector<16x576xf32>
    %7 = tpu.iota {dimensions = array<i32: 0>} : vector<16x16xi32>
    %8 = tpu.iota {dimensions = array<i32: 1>} : vector<16x16xi32>
    %9 = arith.cmpi sge, %7, %8 : vector<16x16xi32>
    %cst_6 = arith.constant 0.000000e+00 : f32
    %cst_7 = arith.constant -1.000000e+30 : f32
    %10 = vector.broadcast %cst_6 : f32 to vector<16x16xf32>
    %11 = vector.broadcast %cst_7 : f32 to vector<16x16xf32>
    %12 = arith.select %9, %10, %11 : vector<16x16xi1>, vector<16x16xf32>
    %13 = vector.extract_strided_slice %6 {offsets = [0, 0], sizes = [16, 48], strides = [1, 1]} : vector<16x576xf32> to vector<16x48xf32>
    %14 = arith.truncf %13 : vector<16x48xf32> to vector<16x48xbf16>
    %15 = vector.shape_cast %14 : vector<16x48xbf16> to vector<1x16x48xbf16>
    %16 = vector.extract_strided_slice %6 {offsets = [0, 192], sizes = [16, 48], strides = [1, 1]} : vector<16x576xf32> to vector<16x48xf32>
    %17 = arith.truncf %16 : vector<16x48xf32> to vector<16x48xbf16>
    %18 = vector.shape_cast %17 : vector<16x48xbf16> to vector<1x16x48xbf16>
    %19 = vector.extract_strided_slice %6 {offsets = [0, 384], sizes = [16, 48], strides = [1, 1]} : vector<16x576xf32> to vector<16x48xf32>
    %20 = arith.truncf %19 : vector<16x48xf32> to vector<16x48xbf16>
    %21 = vector.shape_cast %20 : vector<16x48xbf16> to vector<1x16x48xbf16>
    "tpu.trace_start"() <{level = 10 : i32, message = "btd,bsd->bts"}> : () -> ()
    %cst_8 = arith.constant dense<0.000000e+00> : vector<1x16x16xf32>
    %22 = tpu.matmul %15, %18, %cst_8 {dimension_numbers = #tpu.dot_dimension_numbers<[2], [2], [1], [1], [0, 0, 0, 1, 1, 1], [0], [0]>} : vector<1x16x48xbf16>, vector<1x16x48xbf16>, vector<1x16x16xf32> -> vector<1x16x16xf32>
    "tpu.trace_stop"() : () -> ()
    %23 = vector.shape_cast %12 : vector<16x16xf32> to vector<1x16x16xf32>
    %24 = arith.addf %22, %23 : vector<1x16x16xf32>
    %cst_9 = arith.constant dense<0xFF800000> : vector<1x16xf32>
    %25 = vector.multi_reduction <maximumf>, %24, %cst_9 [2] : vector<1x16x16xf32> to vector<1x16xf32>
    %26 = vector.shape_cast %25 : vector<1x16xf32> to vector<1x16x1xf32>
    %27 = vector.broadcast %26 : vector<1x16x1xf32> to vector<1x16x16xf32>
    %28 = arith.subf %24, %27 : vector<1x16x16xf32>
    %29 = math.exp %28 : vector<1x16x16xf32>
    %30 = arith.truncf %29 : vector<1x16x16xf32> to vector<1x16x16xbf16>
    "tpu.trace_start"() <{level = 10 : i32, message = "bts,bsd->btd"}> : () -> ()
    %cst_10 = arith.constant dense<0.000000e+00> : vector<1x16x48xf32>
    %31 = tpu.matmul %30, %21, %cst_10 {dimension_numbers = #tpu.dot_dimension_numbers<[2], [1], [1], [2], [0, 0, 0, 1, 1, 2], [0], [0]>} : vector<1x16x16xbf16>, vector<1x16x48xbf16>, vector<1x16x48xf32> -> vector<1x16x48xf32>
    "tpu.trace_stop"() : () -> ()
    %cst_11 = arith.constant dense<0.000000e+00> : vector<1x16xf32>
    %32 = vector.multi_reduction <add>, %29, %cst_11 [2] : vector<1x16x16xf32> to vector<1x16xf32>
    %33 = vector.shape_cast %32 : vector<1x16xf32> to vector<1x16x1xf32>
    %34 = tpu.reciprocal %33 {approx = true} : vector<1x16x1xf32> -> vector<1x16x1xf32>
    %35 = vector.broadcast %34 : vector<1x16x1xf32> to vector<1x16x48xf32>
    %36 = arith.mulf %31, %35 : vector<1x16x48xf32>
    %37 = arith.truncf %36 : vector<1x16x48xf32> to vector<1x16x48xbf16>
    %38 = vector.shape_cast %37 : vector<1x16x48xbf16> to vector<16x48xbf16>
    %39 = vector.extract_strided_slice %6 {offsets = [0, 48], sizes = [16, 48], strides = [1, 1]} : vector<16x576xf32> to vector<16x48xf32>
    %40 = arith.truncf %39 : vector<16x48xf32> to vector<16x48xbf16>
    %41 = vector.shape_cast %40 : vector<16x48xbf16> to vector<1x16x48xbf16>
    %42 = vector.extract_strided_slice %6 {offsets = [0, 240], sizes = [16, 48], strides = [1, 1]} : vector<16x576xf32> to vector<16x48xf32>
    %43 = arith.truncf %42 : vector<16x48xf32> to vector<16x48xbf16>
    %44 = vector.shape_cast %43 : vector<16x48xbf16> to vector<1x16x48xbf16>
    %45 = vector.extract_strided_slice %6 {offsets = [0, 432], sizes = [16, 48], strides = [1, 1]} : vector<16x576xf32> to vector<16x48xf32>
    %46 = arith.truncf %45 : vector<16x48xf32> to vector<16x48xbf16>
    %47 = vector.shape_cast %46 : vector<16x48xbf16> to vector<1x16x48xbf16>
    "tpu.trace_start"() <{level = 10 : i32, message = "btd,bsd->bts"}> : () -> ()
    %cst_12 = arith.constant dense<0.000000e+00> : vector<1x16x16xf32>
    %48 = tpu.matmul %41, %44, %cst_12 {dimension_numbers = #tpu.dot_dimension_numbers<[2], [2], [1], [1], [0, 0, 0, 1, 1, 1], [0], [0]>} : vector<1x16x48xbf16>, vector<1x16x48xbf16>, vector<1x16x16xf32> -> vector<1x16x16xf32>
    "tpu.trace_stop"() : () -> ()
    %49 = vector.shape_cast %12 : vector<16x16xf32> to vector<1x16x16xf32>
    %50 = arith.addf %48, %49 : vector<1x16x16xf32>
    %cst_13 = arith.constant dense<0xFF800000> : vector<1x16xf32>
    %51 = vector.multi_reduction <maximumf>, %50, %cst_13 [2] : vector<1x16x16xf32> to vector<1x16xf32>
    %52 = vector.shape_cast %51 : vector<1x16xf32> to vector<1x16x1xf32>
    %53 = vector.broadcast %52 : vector<1x16x1xf32> to vector<1x16x16xf32>
    %54 = arith.subf %50, %53 : vector<1x16x16xf32>
    %55 = math.exp %54 : vector<1x16x16xf32>
    %56 = arith.truncf %55 : vector<1x16x16xf32> to vector<1x16x16xbf16>
    "tpu.trace_start"() <{level = 10 : i32, message = "bts,bsd->btd"}> : () -> ()
    %cst_14 = arith.constant dense<0.000000e+00> : vector<1x16x48xf32>
    %57 = tpu.matmul %56, %47, %cst_14 {dimension_numbers = #tpu.dot_dimension_numbers<[2], [1], [1], [2], [0, 0, 0, 1, 1, 2], [0], [0]>} : vector<1x16x16xbf16>, vector<1x16x48xbf16>, vector<1x16x48xf32> -> vector<1x16x48xf32>
    "tpu.trace_stop"() : () -> ()
    %cst_15 = arith.constant dense<0.000000e+00> : vector<1x16xf32>
    %58 = vector.multi_reduction <add>, %55, %cst_15 [2] : vector<1x16x16xf32> to vector<1x16xf32>
    %59 = vector.shape_cast %58 : vector<1x16xf32> to vector<1x16x1xf32>
    %60 = tpu.reciprocal %59 {approx = true} : vector<1x16x1xf32> -> vector<1x16x1xf32>
    %61 = vector.broadcast %60 : vector<1x16x1xf32> to vector<1x16x48xf32>
    %62 = arith.mulf %57, %61 : vector<1x16x48xf32>
    %63 = arith.truncf %62 : vector<1x16x48xf32> to vector<1x16x48xbf16>
    %64 = vector.shape_cast %63 : vector<1x16x48xbf16> to vector<16x48xbf16>
    %65 = vector.extract_strided_slice %6 {offsets = [0, 96], sizes = [16, 48], strides = [1, 1]} : vector<16x576xf32> to vector<16x48xf32>
    %66 = arith.truncf %65 : vector<16x48xf32> to vector<16x48xbf16>
    %67 = vector.shape_cast %66 : vector<16x48xbf16> to vector<1x16x48xbf16>
    %68 = vector.extract_strided_slice %6 {offsets = [0, 288], sizes = [16, 48], strides = [1, 1]} : vector<16x576xf32> to vector<16x48xf32>
    %69 = arith.truncf %68 : vector<16x48xf32> to vector<16x48xbf16>
    %70 = vector.shape_cast %69 : vector<16x48xbf16> to vector<1x16x48xbf16>
    %71 = vector.extract_strided_slice %6 {offsets = [0, 480], sizes = [16, 48], strides = [1, 1]} : vector<16x576xf32> to vector<16x48xf32>
    %72 = arith.truncf %71 : vector<16x48xf32> to vector<16x48xbf16>
    %73 = vector.shape_cast %72 : vector<16x48xbf16> to vector<1x16x48xbf16>
    "tpu.trace_start"() <{level = 10 : i32, message = "btd,bsd->bts"}> : () -> ()
    %cst_16 = arith.constant dense<0.000000e+00> : vector<1x16x16xf32>
    %74 = tpu.matmul %67, %70, %cst_16 {dimension_numbers = #tpu.dot_dimension_numbers<[2], [2], [1], [1], [0, 0, 0, 1, 1, 1], [0], [0]>} : vector<1x16x48xbf16>, vector<1x16x48xbf16>, vector<1x16x16xf32> -> vector<1x16x16xf32>
    "tpu.trace_stop"() : () -> ()
    %75 = vector.shape_cast %12 : vector<16x16xf32> to vector<1x16x16xf32>
    %76 = arith.addf %74, %75 : vector<1x16x16xf32>
    %cst_17 = arith.constant dense<0xFF800000> : vector<1x16xf32>
    %77 = vector.multi_reduction <maximumf>, %76, %cst_17 [2] : vector<1x16x16xf32> to vector<1x16xf32>
    %78 = vector.shape_cast %77 : vector<1x16xf32> to vector<1x16x1xf32>
    %79 = vector.broadcast %78 : vector<1x16x1xf32> to vector<1x16x16xf32>
    %80 = arith.subf %76, %79 : vector<1x16x16xf32>
    %81 = math.exp %80 : vector<1x16x16xf32>
    %82 = arith.truncf %81 : vector<1x16x16xf32> to vector<1x16x16xbf16>
    "tpu.trace_start"() <{level = 10 : i32, message = "bts,bsd->btd"}> : () -> ()
    %cst_18 = arith.constant dense<0.000000e+00> : vector<1x16x48xf32>
    %83 = tpu.matmul %82, %73, %cst_18 {dimension_numbers = #tpu.dot_dimension_numbers<[2], [1], [1], [2], [0, 0, 0, 1, 1, 2], [0], [0]>} : vector<1x16x16xbf16>, vector<1x16x48xbf16>, vector<1x16x48xf32> -> vector<1x16x48xf32>
    "tpu.trace_stop"() : () -> ()
    %cst_19 = arith.constant dense<0.000000e+00> : vector<1x16xf32>
    %84 = vector.multi_reduction <add>, %81, %cst_19 [2] : vector<1x16x16xf32> to vector<1x16xf32>
    %85 = vector.shape_cast %84 : vector<1x16xf32> to vector<1x16x1xf32>
    %86 = tpu.reciprocal %85 {approx = true} : vector<1x16x1xf32> -> vector<1x16x1xf32>
    %87 = vector.broadcast %86 : vector<1x16x1xf32> to vector<1x16x48xf32>
    %88 = arith.mulf %83, %87 : vector<1x16x48xf32>
    %89 = arith.truncf %88 : vector<1x16x48xf32> to vector<1x16x48xbf16>
    %90 = vector.shape_cast %89 : vector<1x16x48xbf16> to vector<16x48xbf16>
    %91 = vector.extract_strided_slice %6 {offsets = [0, 144], sizes = [16, 48], strides = [1, 1]} : vector<16x576xf32> to vector<16x48xf32>
    %92 = arith.truncf %91 : vector<16x48xf32> to vector<16x48xbf16>
    %93 = vector.shape_cast %92 : vector<16x48xbf16> to vector<1x16x48xbf16>
    %94 = vector.extract_strided_slice %6 {offsets = [0, 336], sizes = [16, 48], strides = [1, 1]} : vector<16x576xf32> to vector<16x48xf32>
    %95 = arith.truncf %94 : vector<16x48xf32> to vector<16x48xbf16>
    %96 = vector.shape_cast %95 : vector<16x48xbf16> to vector<1x16x48xbf16>
    %97 = vector.extract_strided_slice %6 {offsets = [0, 528], sizes = [16, 48], strides = [1, 1]} : vector<16x576xf32> to vector<16x48xf32>
    %98 = arith.truncf %97 : vector<16x48xf32> to vector<16x48xbf16>
    %99 = vector.shape_cast %98 : vector<16x48xbf16> to vector<1x16x48xbf16>
    "tpu.trace_start"() <{level = 10 : i32, message = "btd,bsd->bts"}> : () -> ()
    %cst_20 = arith.constant dense<0.000000e+00> : vector<1x16x16xf32>
    %100 = tpu.matmul %93, %96, %cst_20 {dimension_numbers = #tpu.dot_dimension_numbers<[2], [2], [1], [1], [0, 0, 0, 1, 1, 1], [0], [0]>} : vector<1x16x48xbf16>, vector<1x16x48xbf16>, vector<1x16x16xf32> -> vector<1x16x16xf32>
    "tpu.trace_stop"() : () -> ()
    %101 = vector.shape_cast %12 : vector<16x16xf32> to vector<1x16x16xf32>
    %102 = arith.addf %100, %101 : vector<1x16x16xf32>
    %cst_21 = arith.constant dense<0xFF800000> : vector<1x16xf32>
    %103 = vector.multi_reduction <maximumf>, %102, %cst_21 [2] : vector<1x16x16xf32> to vector<1x16xf32>
    %104 = vector.shape_cast %103 : vector<1x16xf32> to vector<1x16x1xf32>
    %105 = vector.broadcast %104 : vector<1x16x1xf32> to vector<1x16x16xf32>
    %106 = arith.subf %102, %105 : vector<1x16x16xf32>
    %107 = math.exp %106 : vector<1x16x16xf32>
    %108 = arith.truncf %107 : vector<1x16x16xf32> to vector<1x16x16xbf16>
    "tpu.trace_start"() <{level = 10 : i32, message = "bts,bsd->btd"}> : () -> ()
    %cst_22 = arith.constant dense<0.000000e+00> : vector<1x16x48xf32>
    %109 = tpu.matmul %108, %99, %cst_22 {dimension_numbers = #tpu.dot_dimension_numbers<[2], [1], [1], [2], [0, 0, 0, 1, 1, 2], [0], [0]>} : vector<1x16x16xbf16>, vector<1x16x48xbf16>, vector<1x16x48xf32> -> vector<1x16x48xf32>
    "tpu.trace_stop"() : () -> ()
    %cst_23 = arith.constant dense<0.000000e+00> : vector<1x16xf32>
    %110 = vector.multi_reduction <add>, %107, %cst_23 [2] : vector<1x16x16xf32> to vector<1x16xf32>
    %111 = vector.shape_cast %110 : vector<1x16xf32> to vector<1x16x1xf32>
    %112 = tpu.reciprocal %111 {approx = true} : vector<1x16x1xf32> -> vector<1x16x1xf32>
    %113 = vector.broadcast %112 : vector<1x16x1xf32> to vector<1x16x48xf32>
    %114 = arith.mulf %109, %113 : vector<1x16x48xf32>
    %115 = arith.truncf %114 : vector<1x16x48xf32> to vector<1x16x48xbf16>
    %116 = vector.shape_cast %115 : vector<1x16x48xbf16> to vector<16x48xbf16>
    %117 = tpu.concatenate %38, %64, %90, %116 in 1 : vector<16x48xbf16>, vector<16x48xbf16>, vector<16x48xbf16>, vector<16x48xbf16> -> vector<16x192xbf16>
    %c0_24 = arith.constant 0 : index
    %c0_25 = arith.constant 0 : index
    %118 = vector.load %arg4[%c0_24, %c0_25] : memref<192x192xbf16, #tpu.memory_space<vmem>>, vector<192x192xbf16>
    %cst_26 = arith.constant dense<0.000000e+00> : vector<16x192xf32>
    %119 = tpu.matmul %117, %118, %cst_26 {dimension_numbers = #tpu.dot_dimension_numbers<[1], [0], [0], [1], [0, 0, 1, 1], [], []>} : vector<16x192xbf16>, vector<192x192xbf16>, vector<16x192xf32> -> vector<16x192xf32>
    %c0_27 = arith.constant 0 : index
    %c0_28 = arith.constant 0 : index
    %120 = vector.load %arg5[%c0_27, %c0_28] : memref<1x192xf32, #tpu.memory_space<vmem>>, vector<1x192xf32>
    %121 = vector.broadcast %120 : vector<1x192xf32> to vector<16x192xf32>
    %122 = arith.addf %119, %121 : vector<16x192xf32>
    %123 = vector.shape_cast %122 : vector<16x192xf32> to vector<1x16x192xf32>
    %c0_29 = arith.constant 0 : index
    %c0_30 = arith.constant 0 : index
    %c0_31 = arith.constant 0 : index
    %124 = vector.load %arg6[%c0_29, %c0_30, %c0_31] : memref<1x16x192xf32, #tpu.memory_space<vmem>>, vector<1x16x192xf32>
    tpu.vector_store %arg6[%c0_29, %c0_30, %c0_31], %123 {strides = array<i32>} : memref<1x16x192xf32, #tpu.memory_space<vmem>>, vector<1x16x192xf32>,
    return
  }
  func.func @transform_0(%arg0: i32) -> (i32, i32, i32) {
    %c0_i32 = arith.constant 0 : i32
    %c0_i32_0 = arith.constant 0 : i32
    %c0_i32_1 = arith.constant 0 : i32
    return %arg0, %c0_i32, %c0_i32_0 : i32, i32, i32
  }
  func.func @transform_1(%arg0: i32) -> (i32, i32) {
    %c0_i32 = arith.constant 0 : i32
    %c0_i32_0 = arith.constant 0 : i32
    %c0_i32_1 = arith.constant 0 : i32
    return %c0_i32, %c0_i32_0 : i32, i32
  }
  func.func @transform_2(%arg0: i32) -> (i32, i32) {
    %c0_i32 = arith.constant 0 : i32
    %c0_i32_0 = arith.constant 0 : i32
    %c0_i32_1 = arith.constant 0 : i32
    return %c0_i32, %c0_i32_0 : i32, i32
  }
  func.func @transform_3(%arg0: i32) -> (i32, i32) {
    %c0_i32 = arith.constant 0 : i32
    %c0_i32_0 = arith.constant 0 : i32
    %c0_i32_1 = arith.constant 0 : i32
    return %c0_i32, %c0_i32_0 : i32, i32
  }
  func.func @transform_4(%arg0: i32) -> (i32, i32) {
    %c0_i32 = arith.constant 0 : i32
    %c0_i32_0 = arith.constant 0 : i32
    %c0_i32_1 = arith.constant 0 : i32
    return %c0_i32, %c0_i32_0 : i32, i32
  }
  func.func @transform_5(%arg0: i32) -> (i32, i32, i32) {
    %c0_i32 = arith.constant 0 : i32
    %c0_i32_0 = arith.constant 0 : i32
    %c0_i32_1 = arith.constant 0 : i32
    return %arg0, %c0_i32, %c0_i32_0 : i32, i32, i32
  }
}

</mosaic_0001>

<bundles_post_ra>
// kernel: tpu_custom_call.1
= control target key start
LH: loop header
LB: loop body
LE: loop exit
PB: predicated region body
PF: predicated region fallthrough
CT: control target
= control target key end

     0   :  { %10 = vsyncpa [#allocation3], 0  ;;  %s2743_s0 = inlined_call_operand.hbm [shape: bf16[2,16,192], index: 0, kind: input, shape index: {}]   ;;  %s2744_s1 = inlined_call_operand.hbm [shape: bf16[192,576], index: 1, kind: input, shape index: {}]   ;;  %s2745_s2 = inlined_call_operand.hbm [shape: f32[1,576], index: 2, kind: input, shape index: {}]   ;;  %s2746_s3 = inlined_call_operand.hbm [shape: bf16[192,192], index: 3, kind: input, shape index: {}]   ;;  %s2747_s4 = inlined_call_operand.vmem [shape: f32[1,192], index: 4, kind: input, shape index: {}]   ;;  %s2748_s5 = inlined_call_operand.hbm [shape: f32[2,16,192], index: 5, kind: output, shape index: {}]  }
   0x1   :  { %12 = vsyncpa [#allocation3 + $0x1], 0 }
   0x2   :  { %13 = vsyncpa [#allocation6], 0 }
   0x3   :  { %14 = vsyncpa [#allocation9], 0 }
   0x4   :  { %15 = vsyncpa [#allocation4], 0 }
   0x5   :  { %17 = vsyncpa [#allocation4 + $0x1], 0  ;;  %s2356_s18 = smov 0   ;;  %s2358_s19 = smov 0  }
   0x6   :  { %s2360_s20 = smov 0   ;;  %s2362_s21 = smov 0  }
   0x7 LB: > { %s2377_s22 = sadd.s32 4294967295, %s2303_s21   ;;  %s1693_s23 = sadd.s32 4294967294, %s2303_s21   ;;  %s2303_s21 = sphi %s2362_s21, %s2774_s21   ;;  %s2299_s20 = sphi %s2360_s20, %s2773_s20   ;;  %s2295_s19 = sphi %s2358_s19, %s2772_s19   ;;  %s2291_s18 = sphi %s2356_s18, %s2771_s18  }
   0x8   : > { %p43_p0 = scmp.ne.s32.totalorder %s2295_s19, %s2291_s18  ;;  %p2749_p1 = scmp.eq.s32.totalorder %s2377_s22, 0 }
   0x9   : > { %p157_p3 = scmp.eq.s32.totalorder %s1693_s23, 1  ;;  %p1694_p5 = scmp.ge.s32.totalorder %s2303_s21, 1 }
   0xa   : > { %p2386_p4 = por %p2749_p1, %p43_p0  ;;  %p164_p7 = scmp.lt.s32.totalorder %s2303_s21, 3 }
   0xb   : > { %p2391_p6 = por %p157_p3, %p43_p0  ;;  %s2305_s27 = smov [#allocation5]  }
   0xc   : > { %s2754_s24 = scalar_select %p2386_p4, 1, 0 }
   0xd   : > { %s2755_s25 = scalar_select %p2391_p6, 1, 0 }
   0xe   : > { %p2396_p8 = pnand %p1694_p5, %p164_p7  ;;  %s176_s28 = sshll.u32 %s2305_s27, 4  ;;  %s177_s28 = int_to_ptr.vmem [resolvable:$true] %s176_s28 }
   0xf   : > { %s2306_s30 = smov [#allocation7]   ;;  %s2307_s7 = smov [#allocation8]  }
  0x10   : > { %s2756_s26 = scalar_select %p2396_p8, 1, 0 }
  0x11   : > { %p1893_p9 = pneg %p2396_p8  ;;  %s190_s6 = sshll.u32 %s2306_s30, 4  ;;  %s191_s6 = int_to_ptr.vmem [resolvable:$true] %s190_s6 }
  0x12   : > { %s200_s8 = sshll.u32 %s2307_s7, 4  ;;  %s2136_s9 = scalar_lea.vmem %s177_s28, 7680  ;;  %s201_s8 = int_to_ptr.vmem [resolvable:$true] %s200_s8 }
  0x13   : > { %p2405_p11 = pnand %p1893_p9, %p2749_p1  ;;  %p2137_p13 = scmp.ne.s32.totalorder %s177_s28, %s2136_s9 }
  0x14   : > { %p2144_p5 = scmp.lt.s32.totalorder %s177_s28, %s177_s28  ;;  %p2145_p7 = scmp.lt.s32.totalorder %s2136_s9, %s2136_s9 }
  0x15   : > { %p2127_p12 = pneg %p2405_p11 }
  0x16   : > { %p2146_p9 = por %p2145_p7, %p2144_p5 }
  0x17   : > { %p2139_p0 = pnand %p2137_p13, %p2127_p12 }
  0x19   : > { %p2140_p3 = pneg %p2139_p0 }
  0x1b   : > { %p2147_p10 = pnand %p2146_p9, %p2140_p3 }
  0x1d   : > { %2150 = shalt.err (!%p2147_p10)
}
  0x1e   : > { %s2308_s10 = smov 320   ;;  %s2309_s11 = smov 20  }
  0x1f   : > { %1896 = dma.hbm_to_vmem [thread:$0]  (!%p2405_p11), %s2744_s1, 7680, %s177_s28, [#allocation6], %s2308_s10, %s2308_s10, %s2309_s11  }
  0x20   : > { %s2162_s14 = scalar_lea.vmem %s191_s6, 80  ;;  %s2169_s15 = scalar_lea.vmem %s191_s6, 96 }
  0x21   : > { %p2163_p1 = scmp.ne.s32.totalorder %s191_s6, %s2162_s14  ;;  %p2170_p2 = scmp.lt.s32.totalorder %s191_s6, %s191_s6 }
  0x22   : > { %p2171_p5 = scmp.lt.s32.totalorder %s2169_s15, %s2162_s14 }
  0x23   : > { %p2165_p13 = pnand %p2163_p1, %p2127_p12 }
  0x24   : > { %p2172_p3 = por %p2171_p5, %p2170_p2 }
  0x25   : > { %p2166_p0 = pneg %p2165_p13 }
  0x27   : > { %p2173_p10 = pnand %p2172_p3, %p2166_p0 }
  0x29   : > { %2176 = shalt.err (!%p2173_p10)
}
  0x2a   : > { %1899 = dma.hbm_to_vmem [thread:$0]  (!%p2405_p11), %s2745_s2, 80, %s191_s6, [#allocation6]  }
  0x2b   : > { %s2188_s23 = scalar_lea.vmem %s201_s8, 3072  ;;  %p2196_p13 = scmp.lt.s32.totalorder %s201_s8, %s201_s8 }
  0x2c   : > { %p2189_p7 = scmp.ne.s32.totalorder %s201_s8, %s2188_s23  ;;  %p2197_p6 = scmp.lt.s32.totalorder %s2188_s23, %s2188_s23 }
  0x2e   : > { %p2191_p1 = pnand %p2189_p7, %p2127_p12  ;;  %p2198_p4 = por %p2197_p6, %p2196_p13 }
  0x30   : > { %p2192_p9 = pneg %p2191_p1 }
  0x32   : > { %p2199_p2 = pnand %p2198_p4, %p2192_p9 }
  0x34   : > { %2202 = shalt.err (!%p2199_p2)
}
  0x35   : > { %s2751_s27 = smov 128   ;;  %s2311_s28 = smov 8  }
  0x36   : > { %1902 = dma.hbm_to_vmem [thread:$0]  (!%p2405_p11), %s2746_s3, 3072, %s201_s8, [#allocation9], %s2751_s27, %s2751_s27, %s2311_s28  }
  0x37   : > { %s2439_s7 = sadd.s32 1, %s2303_s21   ;;  %s30_s10 = sadd.s32 1, %s2299_s20 }
  0x38   : > { %s27_s9 = ssub.s32 %s2303_s21, %s2439_s7  ;;  %p37_p6 = scmp.ne.s32.totalorder %s2299_s20, %s2295_s19 }
  0x39   : > { %p28_p4 = scmp.eq.s32.totalorder %s27_s9, 0  ;;  %p38_p12 = scmp.eq.s32.totalorder %s2303_s21, 0 }
  0x3a   : > { %p1914_p0 = scmp.lt.s32.totalorder %s2303_s21, 2  ;;  %p2758_p3 = scmp.eq.s32.totalorder %s2377_s22, 1 }
  0x3b   : > { %s2449_s11 = scalar_select %p28_p4, %s2299_s20, %s30_s10  }
  0x3c   : > { %p39_p5 = por %p38_p12, %p37_p6  ;;  %p2453_p10 = por %p2758_p3, %p37_p6 }
  0x3d   : > { %s217_s12 = sand.u32 1, %s2299_s20   ;;  %s1811_s13 = sshll.u32 %s2303_s21, 8 }
  0x3e   : > { %s2759_s29 = scalar_select %p2453_p10, 1, 0 }
  0x3f   : > { %s1699_s8 = sshll.u32 %s217_s12, 4  ;;  %s2462_s16 = scalar_lea.hbm %s2743_s0, %s1811_s13 }
  0x40   : > { %s221_s17 = scalar_lea.vmem [#allocation2], %s1699_s8  ;;  %p2464_p11 = pnand %p1914_p0, %p39_p5 }
  0x41   : > { %s228_s23 = sshll.u32 %s221_s17, 4  ;;  %s2470_s6 = scalar_lea.sflag [#allocation3], %s217_s12  ;;  %s2468_s23 = int_to_ptr.vmem [resolvable:$true] %s228_s23 }
  0x42   : > { %s2203_s9 = scalar_lea.hbm %s2462_s16, 256  ;;  %p2205_p1 = pneg %p2464_p11 }
  0x43   : > { %p2204_p7 = scmp.ne.s32.totalorder %s2462_s16, %s2203_s9  ;;  %s2208_s8 = scalar_lea.hbm %s2743_s0, 512 }
  0x44   : > { %p2209_p2 = scmp.lt.s32.totalorder %s2462_s16, %s2743_s0  ;;  %p2210_p4 = scmp.lt.s32.totalorder %s2208_s8, %s2203_s9 }
  0x45   : > { %p2206_p9 = pnand %p2205_p1, %p2204_p7 }
  0x46   : > { %p2211_p6 = por %p2210_p4, %p2209_p2 }
  0x47   : > { %p2207_p13 = pneg %p2206_p9 }
  0x49   : > { %p2212_p12 = pnand %p2211_p6, %p2207_p13 }
  0x4b   : > { %2215 = shalt.err (!%p2212_p12)
}
  0x4c   : > { %s2216_s12 = scalar_lea.vmem %s2468_s23, 256  ;;  %s2312_s17 = smov [#allocation2]  }
  0x4d   : > { %p2217_p0 = scmp.ne.s32.totalorder %s2468_s23, %s2216_s12  ;;  %s2221_s27 = sshll.u32 %s2312_s17, 4  ;;  %s2222_s27 = int_to_ptr.vmem [resolvable:$false] %s2221_s27 }
  0x4e   : > { %s2223_s10 = scalar_lea.vmem %s2222_s27, 512  ;;  %p2224_p7 = scmp.lt.s32.totalorder %s2468_s23, %s2222_s27 }
  0x4f   : > { %p2219_p5 = pnand %p2217_p0, %p2205_p1  ;;  %p2225_p9 = scmp.lt.s32.totalorder %s2223_s10, %s2216_s12 }
  0x51   : > { %p2220_p3 = pneg %p2219_p5  ;;  %p2226_p10 = por %p2225_p9, %p2224_p7 }
  0x53   : > { %p2227_p8 = pnand %p2226_p10, %p2220_p3 }
  0x55   : > { %2230 = shalt.err (!%p2227_p8)
}
  0x56   : > { %s2761_s9 = smov 128   ;;  %p2762_p1 = scmp.ne.s32.totalorder %s2756_s26, 0 }
  0x57   : > { %1906 = dma.hbm_to_vmem [thread:$0]  (!%p2464_p11), %s2462_s16, 256, %s2468_s23, %s2470_s6, %s2761_s9, %s2761_s9, %s2311_s28  }
  0x58   : > { %240 = sbr.rel (%p2762_p1) target bundleno = 2464 (0x9a0), region = 40  ;;  %s2497_s13 = sand.u32 (!%p2762_p1), 1, %s2295_s19  }
  0x59   : > { %s1703_s27 = sshll.u32 (!%p2762_p1), %s2497_s13, 4  ;;  %s243_s8 = scalar_lea.sflag (!%p2762_p1), [#allocation3], %s2497_s13 }
  0x5a   : > { %s2501_s14 = scalar_lea.vmem (!%p2762_p1), [#allocation2], %s1703_s27  ;;  %p2763_p8 = scmp.ne.s32.totalorder (!%p2762_p1), %s2754_s24, 0 }
  0x5d   : > { %2274 = dma.done.wait (%p2763_p8), %s243_s8, 256  }
  0x5e   : > { %2276 = vsyncadd (%p2763_p8), %s243_s8, 4294967040  ;;  %p2764_p10 = scmp.eq.s32.totalorder %s2377_s22, 0 }
  0x60   : > { %2278 = dma.done.wait (%p2764_p10), [#allocation6], 7760   ;;  %p2765_p11 = pmov %p2764_p10 }
  0x61   : > { %p2766_p13 = pmov %p2764_p10 }
  0x62   : > { %2280 = vsyncadd (%p2765_p11), [#allocation6], 4294959536 }
  0x63   : > { %2282 = dma.done.wait (%p2766_p13), [#allocation9], 3072   ;;  %p2767_p2 = pmov %p2764_p10 }
  0x64   : > { %v1970_v0 = vld [vmem:[#allocation5 + $0x11c] ss:$20 sps:$4 sm:$0xff]   ;;  %v1972_v1 = vld [vmem:[#allocation5 + $0x118] ss:$20 sps:$4 sm:$0xff]   ;;  %v1973_v2 = vld [vmem:[#allocation5 + $0xf4] ss:$20 sps:$4 sm:$0xff]   ;;  %v362_v50 = vlaneseq }
  0x65   : > { %2284 = vsyncadd (%p2767_p2), [#allocation9], 4294964224  ;;  %712 = vmatprep.subr.bf16.mxu0 %v1970_v0  ;;  %v1975_v3 = vld [vmem:[#allocation5 + $0xf0] ss:$20 sps:$4 sm:$0xff]   ;;  %v1976_v4 = vld [vmem:[#allocation5 + $0xcc] ss:$20 sps:$4 sm:$0xff]  }
  0x66   : > { %713 = vmatpush1.bf16.msra.mxu0 %v1972_v1  ;;  %v1978_v5 = vld [vmem:[#allocation5 + $0xc8] ss:$20 sps:$4 sm:$0xff]   ;;  %v1979_v6 = vld [vmem:[#allocation5 + $0xa4] ss:$20 sps:$4 sm:$0xff]   ;;  %v1981_v7 = vld [vmem:[#allocation5 + $0xa0] ss:$20 sps:$4 sm:$0xff]  }
  0x67   : > { %714 = vmatprep.subr.bf16.mxu0 %v1973_v2  ;;  %v1982_v8 = vld [vmem:[#allocation5 + $0x7c] ss:$20 sps:$4 sm:$0xff]   ;;  %v1984_v9 = vld [vmem:[#allocation5 + $0x78] ss:$20 sps:$4 sm:$0xff]   ;;  %v1985_v10 = vld [vmem:[#allocation5 + $0x54] ss:$20 sps:$4 sm:$0xff]  }
  0x68   : > { %vm708_vm0 = vcmask 523264   ;;  %v2006_v11 = vld [vmem:[%s2501_s14 + $0x4] ss:$8 sps:$4 sm:$0xff]   ;;  %v2519_v25 = vld [vmem:[%s2501_s14] ss:$8 sps:$4 sm:$0xff]   ;;  %v2524_v51 = vshrl.u32 %v362_v50, 7 }
  0x69   : > { %v1987_v12 = vld [vmem:[#allocation5 + $0x50] ss:$20 sps:$4 sm:$0xff]   ;;  %v1988_v13 = vld [vmem:[#allocation5 + $0x2c] ss:$20 sps:$4 sm:$0xff]   ;;  %1770 = vmatprep.mubr.msk.bf16.mxu0 %vm708_vm0, %v2006_v11  ;;  %1771 = vmatprep.mubr.msk.bf16.mxu1 %vm708_vm0, %v2006_v11  ;;  %v1990_v14 = vld [vmem:[#allocation5 + $0x28] ss:$20 sps:$4 sm:$0xff]  }
  0x6a   : > { %715 = vmatpush1.bf16.msra.mxu0 %v1975_v3  ;;  %v1991_v15 = vld [vmem:[#allocation5 + $0x4] ss:$20 sps:$4 sm:$0xff]   ;;  %v1993_v16 = vld [vmem:[#allocation5] ss:$20 sps:$4 sm:$0xff]   ;;  %v1994_v17 = vld [vmem:[#allocation5 + $0x1bc] ss:$20 sps:$4 sm:$0xff]  }
  0x6b   : > { %716 = vmatprep.subr.bf16.mxu0 %v1976_v4  ;;  %v1996_v18 = vld [vmem:[#allocation5 + $0x1b8] ss:$20 sps:$4 sm:$0xff]   ;;  %v1997_v19 = vld [vmem:[#allocation5 + $0x194] ss:$20 sps:$4 sm:$0xff]   ;;  %v1999_v20 = vld [vmem:[#allocation5 + $0x190] ss:$20 sps:$4 sm:$0xff]  }
  0x6c   : > { %v2000_v21 = vld [vmem:[#allocation5 + $0x16c] ss:$20 sps:$4 sm:$0xff]   ;;  %v2002_v22 = vld [vmem:[#allocation5 + $0x168] ss:$20 sps:$4 sm:$0xff]   ;;  %v2003_v23 = vld [vmem:[#allocation5 + $0x144] ss:$20 sps:$4 sm:$0xff]  }
  0x6d   : > { %v2005_v24 = vld [vmem:[#allocation5 + $0x140] ss:$20 sps:$4 sm:$0xff]   ;;  %v2009_v26 = vld [vmem:[#allocation5 + $0x124] ss:$20 sps:$4 sm:$0xff]   ;;  %v2012_v28 = vld [vmem:[#allocation5 + $0xfc] ss:$20 sps:$4 sm:$0xff]  }
  0x6e   : > { %717 = vmatpush1.bf16.msra.mxu0 %v1978_v5  ;;  %v2011_v27 = vld [vmem:[#allocation5 + $0x120] ss:$20 sps:$4 sm:$0xff]   ;;  %755 = vmatprep.subr.bf16.mxu1 %v2009_v26  ;;  %v2014_v29 = vld [vmem:[#allocation5 + $0xf8] ss:$20 sps:$4 sm:$0xff]   ;;  %v2017_v31 = vld [vmem:[#allocation5 + $0xd0] ss:$20 sps:$4 sm:$0xff]  }
  0x6f   : > { %718 = vmatprep.subr.bf16.mxu0 %v1979_v6  ;;  %756 = vmatpush1.bf16.msra.mxu1 %v2011_v27  ;;  %v2015_v30 = vld [vmem:[#allocation5 + $0xd4] ss:$20 sps:$4 sm:$0xff]   ;;  %v2018_v32 = vld [vmem:[#allocation5 + $0xac] ss:$20 sps:$4 sm:$0xff]   ;;  %v2021_v34 = vld [vmem:[#allocation5 + $0x84] ss:$20 sps:$4 sm:$0xff]  }
  0x70   : > { %757 = vmatprep.subr.bf16.mxu1 %v2012_v28  ;;  %v2020_v33 = vld [vmem:[#allocation5 + $0xa8] ss:$20 sps:$4 sm:$0xff]   ;;  %v2023_v35 = vld [vmem:[#allocation5 + $0x80] ss:$20 sps:$4 sm:$0xff]   ;;  %v2026_v37 = vld [vmem:[#allocation5 + $0x58] ss:$20 sps:$4 sm:$0xff]  }
  0x71   : > { %v2024_v36 = vld [vmem:[#allocation5 + $0x5c] ss:$20 sps:$4 sm:$0xff]   ;;  %v2027_v38 = vld [vmem:[#allocation5 + $0x34] ss:$20 sps:$4 sm:$0xff]   ;;  %v2030_v40 = vld [vmem:[#allocation5 + $0xc] ss:$20 sps:$4 sm:$0xff]  }
  0x72   : > { %719 = vmatpush1.bf16.msra.mxu0 %v1981_v7  ;;  %v2029_v39 = vld [vmem:[#allocation5 + $0x30] ss:$20 sps:$4 sm:$0xff]   ;;  %v2032_v41 = vld [vmem:[#allocation5 + $0x8] ss:$20 sps:$4 sm:$0xff]   ;;  %v2035_v43 = vld [vmem:[#allocation5 + $0x1c0] ss:$20 sps:$4 sm:$0xff]  }
  0x73   : > { %720 = vmatprep.subr.bf16.mxu0 %v1982_v8  ;;  %758 = vmatpush1.bf16.msra.mxu1 %v2014_v29  ;;  %v2033_v42 = vld [vmem:[#allocation5 + $0x1c4] ss:$20 sps:$4 sm:$0xff]   ;;  %v2036_v44 = vld [vmem:[#allocation5 + $0x19c] ss:$20 sps:$4 sm:$0xff]   ;;  %v2039_v46 = vld [vmem:[#allocation5 + $0x174] ss:$20 sps:$4 sm:$0xff]  }
  0x74   : > { %759 = vmatprep.subr.bf16.mxu1 %v2015_v30  ;;  %v2038_v45 = vld [vmem:[#allocation5 + $0x198] ss:$20 sps:$4 sm:$0xff]   ;;  %v2041_v47 = vld [vmem:[#allocation5 + $0x170] ss:$20 sps:$4 sm:$0xff]   ;;  %v2044_v49 = vld [vmem:[#allocation5 + $0x148] ss:$20 sps:$4 sm:$0xff]  }
  0x75   : > { %v2042_v48 = vld [vmem:[#allocation5 + $0x14c] ss:$20 sps:$4 sm:$0xff]   ;;  %v364_v52 = vsub.s32 0, %v2524_v51  ;;  %v2313_v54 = vmov 0.0   ;;  %v368_v55 = vsub.s32 1, %v2524_v51  ;;  %vm2314_vm1 = vmmov 0  }
  0x76   : > { %721 = vmatpush1.bf16.msra.mxu0 %v1984_v9  ;;  %v2527_v53 = vld [vmem:[#allocation7] sm:$0x1f]  ;;  %s2315_s24 = smov 16   ;;  %s2316_s26 = smov 64   ;;  %v372_v4 = vsub.s32 2, %v2524_v51  ;;  %vm854_vm2 = vcmask 392192  }
  0x77   : > { %722 = vmatprep.subr.bf16.mxu0 %v1985_v10  ;;  %760 = vmatpush1.bf16.msra.mxu1 %v2017_v31  ;;  %v365_v57 = vrot.slane %v2527_v53, %v364_v52  ;;  %v369_v59 = vrot.slane %v2527_v53, %v368_v55  ;;  %v376_v5 = vsub.s32 3, %v2524_v51  ;;  %vm902_vm5 = vcmask 130048   ;;  %s2318_s28 = smov 80   ;;  %s2319_s16 = smov 32  }
  0x78   : > { %761 = vmatprep.subr.bf16.mxu1 %v2018_v32  ;;  %v373_v7 = vrot.slane %v2527_v53, %v372_v4  ;;  %v2320_v4 = vmov 0   ;;  %s2321_s23 = smov 96   ;;  %vm1106_vm6 = vcmask 261120   ;;  %s2322_s30 = smov 48   ;;  %vm1366_vm7 = vcmask 785408  }
  0x79   : > { %v377_v10 = vrot.slane %v2527_v53, %v376_v5  ;;  %v2046_v5 = vld [vmem:[#allocation5 + $0x100] ss:$20 sps:$4 sm:$0xff]   ;;  %s2323_s6 = smov 112   ;;  %s1707_s17 = sshll.u32 %s2497_s13, 5 }
  0x7a   : > { %723 = vmatpush1.bf16.msra.mxu0 %v1987_v12  ;;  %s284_s10 = scalar_lea.vmem [#allocation10], %s1707_s17  ;;  %s1812_s27 = sshll.u32 %s2377_s22, 9 }
  0x7b   : > { %724 = vmatprep.subr.bf16.mxu0 %v1988_v13  ;;  %762 = vmatpush1.bf16.msra.mxu1 %v2020_v33  ;;  %s1591_s9 = sshll.u32 %s284_s10, 4  ;;  %p2768_p6 = scmp.ne.s32.totalorder %s2759_s29, 0  ;;  %s2693_s9 = int_to_ptr.vmem [resolvable:$true] %s1591_s9 }
  0x7c   : > { %763 = vmatprep.subr.bf16.mxu1 %v2021_v34  ;;  %s2231_s22 = scalar_lea.vmem %s2693_s9, 512 }
  0x7d   : > { %p2232_p4 = scmp.ne.s32.totalorder %s2693_s9, %s2231_s22 }
  0x7e   : > { %725 = vmatpush1.bf16.msra.mxu0 %v1990_v14 }
  0x7f   : > { %726 = vmatprep.subr.bf16.mxu0 %v1991_v15  ;;  %764 = vmatpush1.bf16.msra.mxu1 %v2023_v35  ;;  %p2233_p12 = pnand %p2232_p4, %p2768_p6 }
  0x80   : > { %765 = vmatprep.subr.bf16.mxu1 %v2024_v36 }
  0x81   : > { %p2234_p0 = pneg %p2233_p12 }
  0x82   : > { %727 = vmatpush1.bf16.msra.mxu0 %v1993_v16 }
  0x83   : > { %736 = vmatprep.subr.bf16.mxu0 %v1994_v17  ;;  %766 = vmatpush1.bf16.msra.mxu1 %v2026_v37 }
  0x84   : > { %767 = vmatprep.subr.bf16.mxu1 %v2027_v38 }
  0x86   : > { %737 = vmatpush2.bf16.msra.mxu0 %v1996_v18 }
  0x87   : > { %738 = vmatprep.subr.bf16.mxu0 %v1997_v19  ;;  %768 = vmatpush1.bf16.msra.mxu1 %v2029_v39 }
  0x88   : > { %769 = vmatprep.subr.bf16.mxu1 %v2030_v40 }
  0x8a   : > { %739 = vmatpush2.bf16.msra.mxu0 %v1999_v20  ;;  %v843_v20 = vand.u32 127, %v362_v50 }
  0x8b   : > { %740 = vmatprep.subr.bf16.mxu0 %v2000_v21  ;;  %770 = vmatpush1.bf16.msra.mxu1 %v2032_v41  ;;  %v841_v21 = vadd.s32 8, %v2524_v51 }
  0x8c   : > { %779 = vmatprep.subr.bf16.mxu1 %v2033_v42  ;;  %vm844_vm3 = vcmp.ge.s32.totalorder %v2524_v51, %v843_v20 }
  0x8d   : > { %vm845_vm4 = vcmp.ge.s32.totalorder %v841_v21, %v843_v20 }
  0x8e   : > { %741 = vmatpush2.bf16.msra.mxu0 %v2002_v22  ;;  %v2317_v22 = vmov -1e+30  }
  0x8f   : > { %742 = vmatprep.subr.bf16.mxu0 %v2003_v23  ;;  %780 = vmatpush2.bf16.msra.mxu1 %v2035_v43  ;;  %v2564_v23 = vsel %vm844_vm3, 0.0, %v2317_v22  ;;  %v2567_v28 = vsel %vm845_vm4, 0.0, %v2317_v22 }
  0x90   : > { %781 = vmatprep.subr.bf16.mxu1 %v2036_v44 }
  0x92   : > { %743 = vmatpush2.bf16.msra.mxu0 %v2005_v24 }
  0x93   : > { %782 = vmatpush2.bf16.msra.mxu1 %v2038_v45  ;;  %798 = vmatprep.subr.bf16.mxu0 %v2320_v4 }
  0x94   : > { %783 = vmatprep.subr.bf16.mxu1 %v2039_v46 }
  0x95   : > { %745 = vmatmul.mubr.bf16.vlgmr.msra.gmra.mxu0 %v2519_v25 }
  0x96   : > { %1772 = vmatprep.mubr.msk.bf16.mxu0 %vm708_vm0, %v2006_v11 }
  0x97   : > { %784 = vmatpush2.bf16.msra.mxu1 %v2041_v47 }
  0x98   : > { %785 = vmatprep.subr.bf16.mxu1 %v2042_v48 }
  0x9b   : > { %786 = vmatpush2.bf16.msra.mxu1 %v2044_v49 }
  0x9c   : > { %1829 = vmatprep.subr.bf16.mxu1 %v2313_v54 }
  0x9e   : > { %788 = vmatmul.mubr.bf16.vlgmr.msra.gmra.mxu1 %v2519_v25 }
  0x9f   : > { %1831 = vmatprep.mubr.msk.bf16.mxu1 %vm2314_vm1, %v2313_v54 }
 0x155   : > { %v746_v56 = vpop.f32.mrf.mxu0 }
 0x156   : > { %v747_v61 = vadd.f32 %v746_v56, %v365_v57 }
 0x157   : > { %v748_v58 = vpop.f32.mrf.mxu0 }
 0x158   : > { %v749_v0 = vadd.f32 %v748_v58, %v369_v59 }
 0x159   : > { %v750_v60 = vpop.f32.mrf.mxu0 }
 0x15a   : > { %v751_v62 = vadd.f32 %v750_v60, %v365_v57 }
 0x15b   : > { %v752_v63 = vpop.f32.mrf.mxu0 }
 0x15c   : > { %v2539_v1 = vpack.c.bf16 %v751_v62, %v747_v61  ;;  %v753_v2 = vadd.f32 %v752_v63, %v369_v59 }
 0x15e   : > { %v2541_v3 = vpack.c.bf16 %v753_v2, %v749_v0  ;;  %v789_v9 = vpop.f32.mrf.mxu1  ;;  %v2045_v2 = vld [vmem:[#allocation5 + $0x128] ss:$20 sps:$4 sm:$0xff]  }
 0x15f   : > { %v790_v12 = vadd.f32 %v789_v9, %v373_v7  ;;  %799 = vmatpush1.bf16.msra.mxu0 %v2045_v2  ;;  %v2050_v9 = vld [vmem:[#allocation5 + $0x60] ss:$20 sps:$4 sm:$0xff]  }
 0x160   : > { %976 = vrot.lane.b32.xlu1 %v2541_v3, %s2315_s24  ;;  %852 = vrot.lane.b32.xlu0 %v2541_v3, %s2316_s26  ;;  %v791_v11 = vpop.f32.mrf.mxu1  ;;  %s2698_s26 = scalar_lea.hbm %s2748_s5, %s1812_s27 }
 0x161   : > { %v792_v14 = vadd.f32 %v791_v11, %v377_v10  ;;  %800 = vmatprep.subr.bf16.mxu0 %v2320_v4  ;;  %v2052_v11 = vld [vmem:[#allocation5 + $0x10] ss:$20 sps:$4 sm:$0xff]  }
 0x162   : > { %v793_v13 = vpop.f32.mrf.mxu1 }
 0x163   : > { %v794_v15 = vadd.f32 %v793_v13, %v373_v7  ;;  %801 = vmatpush1.bf16.msra.mxu0 %v2046_v5  ;;  %v2048_v7 = vld [vmem:[#allocation5 + $0xb0] ss:$20 sps:$4 sm:$0xff]   ;;  %v2054_v13 = vld [vmem:[#allocation5 + $0x1a0] ss:$20 sps:$4 sm:$0xff]  }
 0x164   : > { %v795_v16 = vpop.f32.mrf.mxu1  ;;  %802 = vmatprep.subr.bf16.mxu0 %v2320_v4 }
 0x165   : > { %v2552_v17 = vpack.c.bf16 %v794_v15, %v790_v12  ;;  %v796_v18 = vadd.f32 %v795_v16, %v377_v10  ;;  %v2051_v10 = vld [vmem:[#allocation5 + $0x38] ss:$20 sps:$4 sm:$0xff]   ;;  %v2053_v12 = vld [vmem:[#allocation5 + $0x1c8] ss:$20 sps:$4 sm:$0xff]  }
 0x167   : > { %v2556_v19 = vpack.c.bf16 %v796_v18, %v792_v14  ;;  %v2055_v14 = vld [vmem:[#allocation5 + $0x178] ss:$20 sps:$4 sm:$0xff]  }
 0x1d2   : > { %v853_v6 = vpop.permute.xlu0 %852  ;;  %v977_v34 = vpop.permute.xlu1 %976 }
 0x1d3   : > { %v859_v8 = vsel %vm854_vm2, %v853_v6, 0  ;;  %v2047_v6 = vld [vmem:[#allocation5 + $0xd8] ss:$20 sps:$4 sm:$0xff]  }
 0x1d4   : > { %1830 = vmatpush3.bf16.xpose.msra.mxu1 %v859_v8  ;;  %803 = vmatpush1.bf16.msra.mxu0 %v2047_v6  ;;  %v2049_v8 = vld [vmem:[#allocation5 + $0x88] ss:$20 sps:$4 sm:$0xff]  }
 0x1d5   : > { %1835 = vmatprep.subr.bf16.mxu1 %v2313_v54  ;;  %804 = vmatprep.subr.bf16.mxu0 %v2320_v4 }
 0x1d8   : > { %805 = vmatpush1.bf16.msra.mxu0 %v2048_v7 }
 0x1d9   : > { %806 = vmatprep.subr.bf16.mxu0 %v2320_v4 }
 0x1db   : > { %1832 = vmatmul.mubr.msk.bf16.vlgmr.msra.gmra.mxu1 %vm854_vm2, %v2539_v1 }
 0x1dc   : > { %1837 = vmatprep.mubr.msk.bf16.mxu1 %vm2314_vm1, %v2313_v54  ;;  %1836 = vmatpush3.bf16.msra.mxu1 %v2556_v19 }
 0x1dd   : > { %1841 = vmatprep.subr.bf16.mxu1 %v2313_v54  ;;  %807 = vmatpush1.bf16.msra.mxu0 %v2049_v8 }
 0x1de   : > { %808 = vmatprep.subr.bf16.mxu0 %v2320_v4 }
 0x1e1   : > { %809 = vmatpush1.bf16.msra.mxu0 %v2050_v9 }
 0x1e2   : > { %810 = vmatprep.subr.bf16.mxu0 %v2320_v4 }
 0x1e5   : > { %811 = vmatpush1.bf16.msra.mxu0 %v2051_v10 }
 0x1e6   : > { %812 = vmatprep.subr.bf16.mxu0 %v2320_v4 }
 0x1e9   : > { %813 = vmatpush1.bf16.msra.mxu0 %v2052_v11 }
 0x1ea   : > { %822 = vmatprep.subr.bf16.mxu0 %v2320_v4 }
 0x1ed   : > { %823 = vmatpush2.bf16.msra.mxu0 %v2053_v12 }
 0x1ee   : > { %824 = vmatprep.subr.bf16.mxu0 %v2320_v4 }
 0x1f1   : > { %825 = vmatpush2.bf16.msra.mxu0 %v2054_v13 }
 0x1f2   : > { %826 = vmatprep.subr.bf16.mxu0 %v2320_v4 }
 0x1f5   : > { %827 = vmatpush2.bf16.msra.mxu0 %v2055_v14 }
 0x1f6   : > { %828 = vmatprep.subr.bf16.mxu0 %v2320_v4 }
 0x29b   : > { %v895_v24 = vpop.f32.mrf.mxu1 }
 0x29c   : > { %v896_v26 = vadd.f32 %v895_v24, %v2564_v23 }
 0x29d   : > { %v1833_v27 = vpop.f32.mrf.mxu1 }
 0x29e   : > { %v903_v29 = vsel %vm902_vm5, %v896_v26, -inf }
 0x29f   : > { %904 = vmax.xlane.f32.xlu0 %v903_v29  ;;  %v898_v30 = vpop.f32.mrf.mxu1 }
 0x2a0   : > { %v899_v31 = vadd.f32 %v898_v30, %v2567_v28 }
 0x2a1   : > { %v1834_v32 = vpop.f32.mrf.mxu1 }
 0x2a2   : > { %v906_v33 = vsel %vm902_vm5, %v899_v31, -inf }
 0x2a3   : > { %907 = vmax.xlane.f32.xlu1 %v906_v33 }
 0x2b4   : > { %978 = vrot.lane.b32.xlu1 %v2552_v17, %s2315_s24 }
 0x2b8   : > { %973 = vrot.lane.b32.xlu1 %v2539_v1, %s2318_s28 }
 0x328   : > { %v905_v35 = vpop.xlane.xlu0 %904 }
 0x329   : > { %v909_v36 = vsub.f32 %v896_v26, %v905_v35 }
 0x32b   : > { %v911_v37 = vmul.f32 1.442695, %v909_v36 }
 0x32c   : > { %v908_v38 = vpop.xlane.xlu1 %907 }
 0x32d   : > { %v910_v39 = vsub.f32 %v899_v31, %v908_v38  ;;  %2093 = vpow2.f32 %v911_v37 }
 0x32f   : > { %v913_v40 = vmul.f32 1.442695, %v910_v39 }
 0x330   : > { %v979_v41 = vpop.permute.xlu1 %978 }
 0x331   : > { %2095 = vpow2.f32 %v913_v40  ;;  %v981_v44 = vsel %vm902_vm5, %v977_v34, %v979_v41  ;;  %v380_v34 = vsub.s32 4, %v2524_v51 }
 0x332   : > { %v986_v46 = vsel %vm854_vm2, %v981_v44, 0 }
 0x333   : > { %v381_v35 = vrot.slane %v2527_v53, %v380_v34 }
 0x334   : > { %v974_v47 = vpop.permute.xlu1 %973 }
 0x33a   : > { %v2576_v42 = vpop.eup %2093 }
 0x33e   : > { %v2578_v43 = vpop.eup %2095 }
 0x33f   : > { %v915_v45 = vpack.c.bf16 %v2578_v43, %v2576_v42 }
 0x341   : > { %1838 = vmatmul.mubr.msk.bf16.vlgmr.msra.gmra.mxu1 %vm902_vm5, %v915_v45 }
 0x342   : > { %1842 = vmatpush3.bf16.xpose.msra.mxu1 %v986_v46  ;;  %1843 = vmatprep.mubr.msk.bf16.mxu1 %vm2314_vm1, %v2313_v54 }
 0x343   : > { %1847 = vmatprep.subr.bf16.mxu1 %v2313_v54 }
 0x349   : > { %1844 = vmatmul.mubr.msk.bf16.vlgmr.msra.gmra.mxu1 %vm854_vm2, %v974_v47 }
 0x34a   : > { %1849 = vmatprep.mubr.msk.bf16.mxu1 %vm2314_vm1, %v2313_v54 }
 0x401   : > { %v2591_v48 = vpop.f32.mrf.mxu1 }
 0x403   : > { %v1839_v49 = vpop.f32.mrf.mxu1 }
 0x405   : > { %v2593_v50 = vpop.f32.mrf.mxu1 }
 0x407   : > { %v1840_v56 = vpop.f32.mrf.mxu1 }
 0x409   : > { %v1022_v57 = vpop.f32.mrf.mxu1 }
 0x40a   : > { %v1023_v58 = vadd.f32 %v1022_v57, %v2564_v23 }
 0x40b   : > { %v1845_v59 = vpop.f32.mrf.mxu1 }
 0x40c   : > { %v1029_v60 = vsel %vm902_vm5, %v1023_v58, -inf }
 0x40d   : > { %1030 = vmax.xlane.f32.xlu1 %v1029_v60  ;;  %v1025_v61 = vpop.f32.mrf.mxu1 }
 0x40e   : > { %v1026_v62 = vadd.f32 %v1025_v61, %v2567_v28 }
 0x40f   : > { %v1846_v63 = vpop.f32.mrf.mxu1 }
 0x410   : > { %v1032_v0 = vsel %vm902_vm5, %v1026_v62, -inf }
 0x411   : > { %1033 = vmax.xlane.f32.xlu0 %v1032_v0 }
 0x41e   : > { %1104 = vrot.lane.b32.xlu1 %v2541_v3, %s2319_s16 }
 0x427   : > { %1043 = vrot.lane.b32.xlu0 %v2556_v19, %s2318_s28  ;;  %s1578_s28 = scalar_lea.sflag [#allocation4], %s2497_s13 }
 0x42b   : > { %1108 = vrot.lane.b32.xlu0 %v2552_v17, %s2321_s23 }
 0x42f   : > { %1102 = vrot.lane.b32.xlu0 %v2539_v1, %s2319_s16  ;;  %v2056_v1 = vld [vmem:[#allocation5 + $0x150] ss:$20 sps:$4 sm:$0xff]  }
 0x430   : > { %829 = vmatpush2.bf16.msra.mxu0 %v2056_v1 }
 0x433   : > { %831 = vmatmul.mubr.bf16.vlgmr.msra.gmra.mxu0 %v2519_v25 }
 0x496   : > { %v1031_v15 = vpop.xlane.xlu1 %1030 }
 0x497   : > { %v1035_v16 = vsub.f32 %v1023_v58, %v1031_v15 }
 0x499   : > { %v1037_v18 = vmul.f32 1.442695, %v1035_v16 }
 0x49a   : > { %v1034_v20 = vpop.xlane.xlu0 %1033  ;;  %v1105_v32 = vpop.permute.xlu1 %1104 }
 0x49b   : > { %v1036_v21 = vsub.f32 %v1026_v62, %v1034_v20  ;;  %2097 = vpow2.f32 %v1037_v18 }
 0x49d   : > { %v1039_v22 = vmul.f32 1.442695, %v1036_v21 }
 0x49e   : > { %v1044_v24 = vpop.permute.xlu0 %1043 }
 0x49f   : > { %2099 = vpow2.f32 %v1039_v22  ;;  %1848 = vmatpush3.bf16.msra.mxu1 %v1044_v24 }
 0x4a0   : > { %1853 = vmatprep.subr.bf16.mxu1 %v2313_v54 }
 0x4a2   : > { %v1109_v29 = vpop.permute.xlu0 %1108 }
 0x4a3   : > { %v1114_v30 = vsel %vm854_vm2, %v1109_v29, 0 }
 0x4a6   : > { %v1103_v31 = vpop.permute.xlu0 %1102 }
 0x4a7   : > { %v1107_v33 = vsel %vm1106_vm6, %v1103_v31, %v1105_v32 }
 0x4a8   : > { %v2609_v26 = vpop.eup %2097 }
 0x4ac   : > { %v2611_v27 = vpop.eup %2099 }
 0x4ad   : > { %v1041_v25 = vpack.c.bf16 %v2611_v27, %v2609_v26 }
 0x4af   : > { %1850 = vmatmul.mubr.msk.bf16.vlgmr.msra.gmra.mxu1 %vm902_vm5, %v1041_v25 }
 0x4b0   : > { %1854 = vmatpush3.bf16.xpose.msra.mxu1 %v1114_v30  ;;  %1855 = vmatprep.mubr.msk.bf16.mxu1 %vm2314_vm1, %v2313_v54  ;;  %v1093_v30 = vsel %vm902_vm5, %v2611_v27, 0.0 }
 0x4b1   : > { %1859 = vmatprep.subr.bf16.mxu1 %v2313_v54 }
 0x4b7   : > { %1856 = vmatmul.mubr.msk.bf16.vlgmr.msra.gmra.mxu1 %vm854_vm2, %v1107_v33 }
 0x4b8   : > { %1861 = vmatprep.mubr.msk.bf16.mxu1 %vm2314_vm1, %v2313_v54 }
 0x4f3   : > { %v832_v36 = vpop.f32.mrf.mxu0 }
 0x4f4   : > { %v833_v38 = vadd.f32 %v832_v36, %v381_v35 }
 0x4f5   : > { %v834_v37 = vpop.f32.mrf.mxu0 }
 0x4f7   : > { %v835_v39 = vpop.f32.mrf.mxu0 }
 0x4f8   : > { %v836_v40 = vadd.f32 %v835_v39, %v381_v35 }
 0x4f9   : > { %v837_v41 = vpop.f32.mrf.mxu0 }
 0x4fa   : > { %v2626_v44 = vpack.c.bf16 %v836_v40, %v833_v38 }
 0x56f   : > { %v2628_v45 = vpop.f32.mrf.mxu1 }
 0x571   : > { %v1851_v46 = vpop.f32.mrf.mxu1 }
 0x572   : > { %v960_v46 = vsel %vm902_vm5, %v2576_v42, 0.0 }
 0x573   : > { %v2630_v47 = vpop.f32.mrf.mxu1 }
 0x575   : > { %v1852_v49 = vpop.f32.mrf.mxu1 }
 0x576   : > { %v963_v49 = vsel %vm902_vm5, %v2578_v43, 0.0  ;;  %v2057_v43 = vld [vmem:[#allocation8 + $0x70] ss:$8 sps:$4 sm:$0xff]  }
 0x577   : > { %v1150_v56 = vpop.f32.mrf.mxu1 }
 0x578   : > { %v1151_v57 = vadd.f32 %v1150_v56, %v2564_v23 }
 0x579   : > { %v1857_v58 = vpop.f32.mrf.mxu1 }
 0x57a   : > { %v1157_v53 = vsel %vm902_vm5, %v1151_v57, -inf }
 0x57b   : > { %1158 = vmax.xlane.f32.xlu0 %v1157_v53  ;;  %v1153_v59 = vpop.f32.mrf.mxu1 }
 0x57c   : > { %v1154_v60 = vadd.f32 %v1153_v59, %v2567_v28 }
 0x57d   : > { %v1858_v61 = vpop.f32.mrf.mxu1 }
 0x57e   : > { %v1160_v62 = vsel %vm902_vm5, %v1154_v60, -inf }
 0x57f   : > { %1161 = vmax.xlane.f32.xlu1 %v1160_v62 }
 0x590   : > { %1173 = vrot.lane.b32.xlu1 %v2626_v44, %s2319_s16 }
 0x591   : > { %1171 = vrot.lane.b32.xlu0 %v2556_v19, %s2319_s16  ;;  %s2324_s16 = smov [#allocation10]  }
 0x595   : > { %1234 = vrot.lane.b32.xlu0 %v2552_v17, %s2322_s30 }
 0x599   : > { %1232 = vrot.lane.b32.xlu0 %v2541_v3, %s2323_s6 }
 0x604   : > { %v1159_v63 = vpop.xlane.xlu0 %1158 }
 0x605   : > { %v1163_v0 = vsub.f32 %v1151_v57, %v1159_v63 }
 0x607   : > { %v1165_v2 = vmul.f32 1.442695, %v1163_v0 }
 0x608   : > { %v1162_v4 = vpop.xlane.xlu1 %1161  ;;  %v1172_v7 = vpop.permute.xlu0 %1171 }
 0x609   : > { %v1164_v5 = vsub.f32 %v1154_v60, %v1162_v4  ;;  %2101 = vpow2.f32 %v1165_v2  ;;  %v2059_v4 = vld [vmem:[#allocation8 + $0x74] ss:$8 sps:$4 sm:$0xff]  }
 0x60a   : > { %1530 = vmatprep.subr.bf16.mxu0 %v2059_v4 }
 0x60b   : > { %v1167_v6 = vmul.f32 1.442695, %v1164_v5  ;;  %v2062_v5 = vld [vmem:[#allocation8 + $0x64] ss:$8 sps:$4 sm:$0xff]   ;;  %1531 = vmatpush1.bf16.msra.mxu0 %v2057_v43 }
 0x60c   : > { %v1174_v8 = vpop.permute.xlu1 %1173  ;;  %v1235_v10 = vpop.permute.xlu0 %1234  ;;  %1532 = vmatprep.subr.bf16.mxu0 %v2062_v5 }
 0x60d   : > { %2103 = vpow2.f32 %v1167_v6  ;;  %v1175_v19 = vsel %vm1106_vm6, %v1172_v7, %v1174_v8  ;;  %v1240_v3 = vsel %vm854_vm2, %v1235_v10, 0  ;;  %v2063_v6 = vld [vmem:[#allocation8 + $0x50] ss:$8 sps:$4 sm:$0xff]   ;;  %v2068_v7 = vld [vmem:[#allocation8 + $0x44] ss:$8 sps:$4 sm:$0xff]  }
 0x60e   : > { %1860 = vmatpush3.bf16.msra.mxu1 %v1175_v19  ;;  %v2066_v8 = vld [vmem:[#allocation8 + $0x40] ss:$8 sps:$4 sm:$0xff]   ;;  %v2071_v19 = vld [vmem:[#allocation8 + $0x34] ss:$8 sps:$4 sm:$0xff]  }
 0x60f   : > { %1865 = vmatprep.subr.bf16.mxu1 %v2313_v54  ;;  %v2072_v10 = vld [vmem:[#allocation8 + $0x20] ss:$8 sps:$4 sm:$0xff]  }
 0x610   : > { %v1233_v12 = vpop.permute.xlu0 %1232 }
 0x616   : > { %v2102_v17 = vpop.eup %2101 }
 0x61a   : > { %v2104_v9 = vpop.eup %2103 }
 0x61b   : > { %v1169_v11 = vpack.c.bf16 %v2104_v9, %v2102_v17 }
 0x61d   : > { %1862 = vmatmul.mubr.msk.bf16.vlgmr.msra.gmra.mxu1 %vm902_vm5, %v1169_v11  ;;  %v2077_v11 = vld [vmem:[#allocation8 + $0x14] ss:$8 sps:$4 sm:$0xff]  }
 0x61e   : > { %1866 = vmatpush3.bf16.xpose.msra.mxu1 %v1240_v3  ;;  %1867 = vmatprep.mubr.msk.bf16.mxu1 %vm2314_vm1, %v2313_v54  ;;  %v2075_v3 = vld [vmem:[#allocation8 + $0x10] ss:$8 sps:$4 sm:$0xff]  }
 0x61f   : > { %1871 = vmatprep.subr.bf16.mxu1 %v2313_v54 }
 0x625   : > { %1868 = vmatmul.mubr.msk.bf16.vlgmr.msra.gmra.mxu1 %vm854_vm2, %v1233_v12  ;;  %v2080_v12 = vld [vmem:[#allocation8 + $0x4] ss:$8 sps:$4 sm:$0xff]  }
 0x626   : > { %1873 = vmatprep.mubr.msk.bf16.mxu1 %vm2314_vm1, %v2313_v54  ;;  %v1090_v54 = vsel %vm902_vm5, %v2609_v26, 0.0 }
 0x6dd   : > { %v1214_v13 = vpop.f32.mrf.mxu1 }
 0x6df   : > { %v1863_v14 = vpop.f32.mrf.mxu1 }
 0x6e0   : > { %v2083_v14 = vld [vmem:[#allocation8 + $0xb4] ss:$8 sps:$4 sm:$0xff]  }
 0x6e1   : > { %v1217_v1 = vpop.f32.mrf.mxu1 }
 0x6e3   : > { %v1864_v15 = vpop.f32.mrf.mxu1 }
 0x6e4   : > { %v2086_v15 = vld [vmem:[#allocation8 + $0xa4] ss:$8 sps:$4 sm:$0xff]  }
 0x6e5   : > { %v1276_v16 = vpop.f32.mrf.mxu1 }
 0x6e6   : > { %v1277_v18 = vadd.f32 %v1276_v16, %v2564_v23  ;;  %v1221_v23 = vsel %vm902_vm5, %v2102_v17, 0.0  ;;  %v2069_v17 = vld [vmem:[#allocation8 + $0x30] ss:$8 sps:$4 sm:$0xff]   ;;  %v2084_v16 = vld [vmem:[#allocation8 + $0xa0] ss:$8 sps:$4 sm:$0xff]  }
 0x6e7   : > { %v1869_v20 = vpop.f32.mrf.mxu1 }
 0x6e8   : > { %v1283_v21 = vsel %vm902_vm5, %v1277_v18, -inf  ;;  %v2087_v20 = vld [vmem:[#allocation8 + $0x90] ss:$8 sps:$4 sm:$0xff]  }
 0x6e9   : > { %1284 = vmax.xlane.f32.xlu0 %v1283_v21  ;;  %v1279_v22 = vpop.f32.mrf.mxu1  ;;  %v2092_v21 = vld [vmem:[#allocation8 + $0x84] ss:$8 sps:$4 sm:$0xff]  }
 0x6ea   : > { %v1280_v24 = vadd.f32 %v1279_v22, %v2567_v28  ;;  %v1224_v28 = vsel %vm902_vm5, %v2104_v9, 0.0  ;;  %v2074_v9 = vld [vmem:[#allocation8 + $0x24] ss:$8 sps:$4 sm:$0xff]   ;;  %v2090_v22 = vld [vmem:[#allocation8 + $0x80] ss:$8 sps:$4 sm:$0xff]  }
 0x6eb   : > { %v1870_v29 = vpop.f32.mrf.mxu1 }
 0x6ec   : > { %v1286_v25 = vsel %vm902_vm5, %v1280_v24, -inf }
 0x6ed   : > { %1287 = vmax.xlane.f32.xlu1 %v1286_v25 }
 0x6f1   : > { %1091 = vadd.xlane.f32.xlu1 %v1090_v54 }
 0x6f5   : > { %1094 = vadd.xlane.f32.xlu1 %v1093_v30 }
 0x6f9   : > { %1222 = vadd.xlane.f32.xlu1 %v1221_v23 }
 0x6ff   : > { %1296 = vrot.lane.b32.xlu0 %v2626_v44, %s2323_s6 }
 0x71e   : > { %1225 = vadd.xlane.f32.xlu0 %v1224_v28 }
 0x772   : > { %v1285_v31 = vpop.xlane.xlu0 %1284 }
 0x773   : > { %v1289_v32 = vsub.f32 %v1277_v18, %v1285_v31  ;;  %v2089_v18 = vld [vmem:[#allocation8 + $0x94] ss:$8 sps:$4 sm:$0xff]  }
 0x775   : > { %v1291_v33 = vmul.f32 1.442695, %v1289_v32 }
 0x776   : > { %v1297_v34 = vpop.permute.xlu0 %1296  ;;  %v1288_v35 = vpop.xlane.xlu1 %1287 }
 0x777   : > { %2105 = vpow2.f32 %v1291_v33  ;;  %v1290_v26 = vsub.f32 %v1280_v24, %v1288_v35  ;;  %1872 = vmatpush3.bf16.msra.mxu1 %v1297_v34 }
 0x779   : > { %v1293_v36 = vmul.f32 1.442695, %v1290_v26 }
 0x77a   : > { %v1092_v37 = vpop.xlane.xlu1 %1091 }
 0x77b   : > { %2107 = vpow2.f32 %v1293_v36 }
 0x77e   : > { %v1095_v44 = vpop.xlane.xlu1 %1094 }
 0x77f   : > { %2109 = vrcp.f32 %v1095_v44 }
 0x780   : > { %2111 = vrcp.f32 %v1092_v37 }
 0x782   : > { %v1223_v60 = vpop.xlane.xlu1 %1222 }
 0x783   : > { %2113 = vrcp.f32 %v1223_v60 }
 0x784   : > { %v2106_v27 = vpop.eup %2105 }
 0x785   : > { %v1343_v38 = vsel %vm902_vm5, %v2106_v27, 0.0 }
 0x786   : > { %1344 = vadd.xlane.f32.xlu1 %v1343_v38 }
 0x788   : > { %v2108_v39 = vpop.eup %2107 }
 0x789   : > { %v1346_v40 = vsel %vm902_vm5, %v2108_v39, 0.0  ;;  %v1295_v41 = vpack.c.bf16 %v2108_v39, %v2106_v27 }
 0x78a   : > { %1347 = vadd.xlane.f32.xlu1 %v1346_v40 }
 0x78b   : > { %1874 = vmatmul.mubr.msk.bf16.vlgmr.msra.gmra.mxu1 %vm902_vm5, %v1295_v41 }
 0x78c   : > { %v2110_v56 = vpop.eup %2109 }
 0x78d   : > { %v2112_v57 = vpop.eup %2111  ;;  %v1099_v58 = vmul.f32 %v2110_v56, %v2630_v47  ;;  %v2065_v47 = vld [vmem:[#allocation8 + $0x54] ss:$8 sps:$4 sm:$0xff]  }
 0x78e   : > { %961 = vadd.xlane.f32.xlu1 %v960_v46  ;;  %v1098_v53 = vmul.f32 %v2112_v57, %v2628_v45  ;;  %v2060_v45 = vld [vmem:[#allocation8 + $0x60] ss:$8 sps:$4 sm:$0xff]  }
 0x78f   : > { %1533 = vmatpush1.bf16.msra.mxu0 %v2060_v45 }
 0x790   : > { %v1100_v59 = vpack.c.bf16 %v1099_v58, %v1098_v53  ;;  %v2114_v42 = vpop.eup %2113  ;;  %1534 = vmatprep.subr.bf16.mxu0 %v2065_v47 }
 0x791   : > { %v1229_v63 = vmul.f32 %v2114_v42, %v1214_v13  ;;  %v2078_v13 = vld [vmem:[#allocation8] ss:$8 sps:$4 sm:$0xff]  }
 0x792   : > { %964 = vadd.xlane.f32.xlu1 %v963_v49 }
 0x793   : > { %1535 = vmatpush1.bf16.msra.mxu0 %v2063_v6 }
 0x794   : > { %1536 = vmatprep.subr.bf16.mxu0 %v2068_v7 }
 0x797   : > { %1537 = vmatpush1.bf16.msra.mxu0 %v2066_v8 }
 0x798   : > { %1538 = vmatprep.subr.bf16.mxu0 %v2071_v19 }
 0x79b   : > { %1539 = vmatpush1.bf16.msra.mxu0 %v2069_v17 }
 0x79c   : > { %1540 = vmatprep.subr.bf16.mxu0 %v2074_v9 }
 0x79f   : > { %1541 = vmatpush1.bf16.msra.mxu0 %v2072_v10 }
 0x7a0   : > { %1542 = vmatprep.subr.bf16.mxu0 %v2077_v11 }
 0x7a3   : > { %1355 = vrot.lane.b32.xlu1 %v1100_v59, %s2322_s30  ;;  %1543 = vmatpush1.bf16.msra.mxu0 %v2075_v3 }
 0x7a4   : > { %1544 = vmatprep.subr.bf16.mxu0 %v2080_v12 }
 0x7a7   : > { %v1226_v61 = vpop.xlane.xlu0 %1225  ;;  %1545 = vmatpush1.bf16.msra.mxu0 %v2078_v13 }
 0x7a8   : > { %2115 = vrcp.f32 %v1226_v61  ;;  %1554 = vmatprep.subr.bf16.mxu0 %v2083_v14 }
 0x7b5   : > { %v2116_v62 = vpop.eup %2115 }
 0x7b6   : > { %v1230_v0 = vmul.f32 %v2116_v62, %v1217_v1  ;;  %v2081_v1 = vld [vmem:[#allocation8 + $0xb0] ss:$8 sps:$4 sm:$0xff]  }
 0x7b7   : > { %1555 = vmatpush2.bf16.msra.mxu0 %v2081_v1 }
 0x7b8   : > { %v1231_v2 = vpack.c.bf16 %v1230_v0, %v1229_v63  ;;  %1556 = vmatprep.subr.bf16.mxu0 %v2086_v15 }
 0x7ba   : > { %1358 = vrot.lane.b32.xlu0 %v1231_v2, %s2321_s23  ;;  %s2235_s23 = sshll.u32 %s2324_s16, 4  ;;  %s2236_s23 = int_to_ptr.vmem [resolvable:$false] %s2235_s23 }
 0x7bb   : > { %1557 = vmatpush2.bf16.msra.mxu0 %v2084_v16  ;;  %s2237_s30 = scalar_lea.vmem %s2236_s23, 1024  ;;  %p2238_p5 = scmp.lt.s32.totalorder %s2693_s9, %s2236_s23 }
 0x7bc   : > { %1558 = vmatprep.subr.bf16.mxu0 %v2089_v18  ;;  %p2239_p3 = scmp.lt.s32.totalorder %s2237_s30, %s2231_s22 }
 0x7be   : > { %p2240_p7 = por %p2239_p3, %p2238_p5 }
 0x7bf   : > { %1559 = vmatpush2.bf16.msra.mxu0 %v2087_v20 }
 0x7c0   : > { %1560 = vmatprep.subr.bf16.mxu0 %v2092_v21  ;;  %p2241_p9 = pnand %p2240_p7, %p2234_p0 }
 0x7c3   : > { %1561 = vmatpush2.bf16.msra.mxu0 %v2090_v22 }
 0x80f   : > { %v1345_v24 = vpop.xlane.xlu1 %1344 }
 0x810   : > { %2117 = vrcp.f32 %v1345_v24 }
 0x813   : > { %v1348_v29 = vpop.xlane.xlu1 %1347 }
 0x814   : > { %2119 = vrcp.f32 %v1348_v29 }
 0x817   : > { %v962_v35 = vpop.xlane.xlu1 %961 }
 0x81b   : > { %v965_v26 = vpop.xlane.xlu1 %964 }
 0x81c   : > { %2121 = vrcp.f32 %v965_v26 }
 0x81d   : > { %v2118_v30 = vpop.eup %2117  ;;  %2123 = vrcp.f32 %v962_v35 }
 0x81f   : > { %v1356_v40 = vpop.permute.xlu1 %1355 }
 0x821   : > { %v2120_v23 = vpop.eup %2119 }
 0x829   : > { %v2122_v36 = vpop.eup %2121 }
 0x82a   : > { %v2124_v27 = vpop.eup %2123  ;;  %v969_v37 = vmul.f32 %v2122_v36, %v2593_v50  ;;  %v1396_v50 = vld [vmem:[%s2747_s4] sm:$0x3] }
 0x82b   : > { %v968_v38 = vmul.f32 %v2124_v27, %v2591_v48  ;;  %v1401_v48 = vrot.slane %v1396_v50, %v364_v52  ;;  %v1405_v57 = vrot.slane %v1396_v50, %v368_v55 }
 0x82c   : > { %v1359_v44 = vpop.permute.xlu0 %1358 }
 0x82d   : > { %v970_v39 = vpack.c.bf16 %v969_v37, %v968_v38 }
 0x82f   : > { %v1365_v41 = vsel %vm854_vm2, %v970_v39, %v1356_v40 }
 0x830   : > { %v1368_v56 = vsel %vm1366_vm7, %v1365_v41, %v1359_v44 }
 0x84b   : > { %v1336_v25 = vpop.f32.mrf.mxu1 }
 0x84c   : > { %v1351_v31 = vmul.f32 %v2118_v30, %v1336_v25 }
 0x84d   : > { %v1875_v54 = vpop.f32.mrf.mxu1 }
 0x84f   : > { %v1339_v28 = vpop.f32.mrf.mxu1 }
 0x850   : > { %v1352_v32 = vmul.f32 %v2120_v23, %v1339_v28 }
 0x851   : > { %v1876_v33 = vpop.f32.mrf.mxu1 }
 0x852   : > { %v1353_v34 = vpack.c.bf16 %v1352_v32, %v1351_v31 }
 0x854   : > { %1361 = vrot.lane.b32.xlu1 %v1353_v34, %s2315_s24 }
 0x8c6   : > { %v1362_v46 = vpop.permute.xlu1 %1361 }
 0x8c7   : > { %v1371_v49 = vsel %vm902_vm5, %v1359_v44, %v1362_v46 }
 0x8c8   : > { %1805 = vmatprep.mubr.msk.bf16.mxu0 %vm708_vm0, %v1371_v49 }
 0x8c9   : > { %1563 = vmatmul.mubr.bf16.vlgmr.msra.gmra.mxu0 %v1368_v56 }
 0x989   : > { %v1564_v58 = vpop.f32.mrf.mxu0 }
 0x98a   : > { %v1565_v53 = vadd.f32 %v1564_v58, %v1401_v48 }
 0x98b   : > { %v1566_v59 = vpop.f32.mrf.mxu0 }
 0x98c   : > { %1573 = vst [vmem:[%s284_s10] sm:$0xff] %v1565_v53  ;;  %v1567_v60 = vadd.f32 %v1566_v59, %v1405_v57 }
 0x98d   : > { %v1568_v61 = vpop.f32.mrf.mxu0 }
 0x98e   : > { %1574 = vst.msk [vmem:[%s284_s10 + $0x8] sm:$0xff] %vm708_vm0, %v1567_v60  ;;  %v1569_v42 = vadd.f32 %v1568_v61, %v1401_v48 }
 0x98f   : > { %v1570_v51 = vpop.f32.mrf.mxu0 }
 0x990   : > { %1575 = vst [vmem:[%s284_s10 + $0x10] sm:$0xff] %v1569_v42  ;;  %v1571_v52 = vadd.f32 %v1570_v51, %v1405_v57 }
 0x992   : > { %1576 = vst.msk [vmem:[%s284_s10 + $0x18] sm:$0xff] %vm708_vm0, %v1571_v52 }
 0x993   : > { %2244 = shalt.err (!%p2241_p9)
}
 0x994   : > { %s2245_s6 = scalar_lea.hbm %s2698_s26, 512  ;;  %s2249_s17 = scalar_lea.hbm %s2748_s5, 1024 }
 0x995   : > { %p2246_p1 = scmp.ne.s32.totalorder %s2698_s26, %s2245_s6  ;;  %p2250_p11 = scmp.lt.s32.totalorder %s2698_s26, %s2748_s5 }
 0x996   : > { %p2251_p13 = scmp.lt.s32.totalorder %s2249_s17, %s2245_s6 }
 0x997   : > { %p2247_p8 = pnand %p2246_p1, %p2768_p6 }
 0x998   : > { %p2252_p2 = por %p2251_p13, %p2250_p11 }
 0x999   : > { %p2248_p10 = pneg %p2247_p8 }
 0x99b   : > { %p2253_p4 = pnand %p2252_p2, %p2248_p10 }
 0x99d   : > { %2256 = shalt.err (!%p2253_p4)
}
 0x99e   : > { %s2325_s8 = smov 256  }
 0x99f   : > { %1891 = dma.vmem_to_hbm [thread:$0]  (%p2768_p6), %s2693_s9, 512, %s2698_s26, %s1578_s28, %s2325_s8, %s2325_s8, %s2315_s24  }
 0x9a0 PF: > { %s1606_s14 = sand.u32 1, %s2291_s18   ;;  %p2769_p12 = scmp.ne.s32.totalorder %s2755_s25, 0 }
 0x9a1   : > { %p2770_p0 = scmp.ge.s32.totalorder %s2303_s21, 2  ;;  %s1607_s22 = scalar_lea.sflag [#allocation4], %s1606_s14 }
 0x9a3   : > { %p1908_p5 = pnand %p2770_p0, %p2769_p12 }
 0x9a5   : > { %p1909_p3 = pneg %p1908_p5 }
 0x9a7   : > { %2286 = dma.done.wait (%p1909_p3), %s1607_s22, 512  }
 0x9a8   : > { %2288 = vsyncadd (%p1909_p3), %s1607_s22, 4294966784  ;;  %p20_p7 = scmp.ge.s32.totalorder %s2439_s7, 4   ;;  %s2771_s18 = smov %s2295_s19 }
 0x9a9   : > { %s2772_s19 = smov %s2299_s20  ;;  %s2773_s20 = smov %s2449_s11 }
 0x9aa   : > { %s2774_s21 = smov %s2439_s7  ;;  %22 = sbr.rel (!%p20_p7) target bundleno = 7 (0x7), region = 97 }
 0x9af   :  { %1612 = vsyncpa [#allocation3], 1 }
 0x9b0   :  { %1614 = vsyncpa [#allocation3 + $0x1], 1 }
 0x9b1   :  { %1615 = vsyncpa [#allocation6], 1 }
 0x9b2   :  { %1616 = vsyncpa [#allocation9], 1 }
 0x9b3   :  { %1617 = vsyncpa [#allocation4], 1 }
 0x9b4   :  { %1619 = vsyncpa [#allocation4 + $0x1], 1 }

</bundles_post_ra>
